<compile_context>
chip_gen: v5e
topology: v5e:2x2
jax: 0.10.0
libtpu: 0.0.40
codegen_flags: <defaults>
</compile_context>

<pallas_src>
import functools
import math

import jax
import jax.numpy as jnp
from jax.experimental import pallas as pl
from jax.experimental.pallas import tpu as pltpu

# ----------------------- synthetic config (cfg) -----------------------
N_EMBD = 32                 # cfg.n_embd  (nx)
N_STATE = 4 * N_EMBD        # n_state passed to MLP (128 -> lane-dense hidden)
AFN = "gelu"                # cfg.afn


# ----------------------- activations (match PyTorch defs) -----------------------
def _gelu(x):
    # OpenAI-GPT tanh-approximation gelu, exactly as in the reference module.
    c = math.sqrt(2.0 / math.pi)
    return 0.5 * x * (1.0 + jnp.tanh(c * (x + 0.044715 * (x * x * x))))


def _swish(x):
    return x * jax.nn.sigmoid(x)


_ACT_FNS = {"relu": lambda x: jnp.maximum(x, 0.0), "swish": _swish, "gelu": _gelu}


# ----------------------- fused MLP kernel -----------------------
def mlp_kernel(x_ref, wfc_ref, bfc_ref, wproj_ref, bproj_ref, out_ref, *, act):
    # x_ref: (block_m // G, G*E) lane-dense — G consecutive token rows per
    # 128-lane row.  Weights are block-diagonal (kron(I_G, W)), so both dots
    # contract the last dim natively on the MXU with no transposes/relayouts.
    x = x_ref[...]
    h = jnp.dot(x, wfc_ref[...], preferred_element_type=jnp.float32)
    h = act(h + bfc_ref[...])                               # (bm_g, G*H)
    y = jnp.dot(h, wproj_ref[...], preferred_element_type=jnp.float32)
    # TODO(synk): nn.Dropout(resid_pdrop) is identity in eval mode; omitted.
    out_ref[...] = (y + bproj_ref[...]).astype(out_ref.dtype)


def mlp_forward(params, x, *, afn=AFN, block_m=1024):
    """x: (..., n_embd) float32.  Returns same shape (MLP forward, eval)."""
    act = _ACT_FNS[afn]
    w_fc, b_fc = params["w_fc"], params["b_fc"]          # (E, H), (H,)
    w_proj, b_proj = params["w_proj"], params["b_proj"]  # (H, E), (E,)
    *lead, E = x.shape
    H = w_fc.shape[1]

    # Pack G token rows per 128-lane row (lane-dense I/O, no masked vld/vst).
    G = 128 // E if (E <= 128 and 128 % E == 0) else 1
    Eg, Hg = G * E, G * H

    x2 = x.reshape(-1, E).astype(jnp.float32)
    M = x2.shape[0]

    # Row block: as big as possible (per-step overhead dominates small tiles),
    # aligned to 8*G so each lane-dense block is whole (8,128) f32 tiles, and
    # sized so typical M needs no padding.  Sweep block_m 512-2048 per chip.
    align = 8 * G
    bm = max(align, min(block_m, M))
    bm = pl.cdiv(bm, align) * align
    Mp = bm * pl.cdiv(M, bm)
    if Mp != M:                      # only for ragged M (< align rows of waste)
        x2 = jnp.pad(x2, ((0, Mp - M), (0, 0)))

    x_dense = x2.reshape(Mp // G, Eg)         # contiguous reshape -> free view

    # Block-diagonal weight packing: y_dense[r, k*E+j] = h-row (G*r+k) @ w[:, j].
    # Built once per call; tiny (<=256 KiB each) and HBM traffic is unchanged
    # asymptotically since weights are loaded once regardless.
    eye = jnp.eye(G, dtype=jnp.float32)
    w_fc_big = jnp.kron(eye, w_fc.astype(jnp.float32))       # (Eg, Hg)
    w_proj_big = jnp.kron(eye, w_proj.astype(jnp.float32))   # (Hg, Eg)
    b_fc_big = jnp.tile(b_fc.astype(jnp.float32), G).reshape(1, Hg)
    b_proj_big = jnp.tile(b_proj.astype(jnp.float32), G).reshape(1, Eg)

    bm_g = bm // G
    grid = (Mp // bm,)
    y_dense = pl.pallas_call(
        functools.partial(mlp_kernel, act=act),
        out_shape=jax.ShapeDtypeStruct((Mp // G, Eg), jnp.float32),
        grid_spec=pltpu.PrefetchScalarGridSpec(
            num_scalar_prefetch=0,
            grid=grid,
            in_specs=[
                pl.BlockSpec((bm_g, Eg), lambda i: (i, 0)),   # x rows (lane-dense)
                pl.BlockSpec((Eg, Hg), lambda i: (0, 0)),     # w_fc   (block-diag)
                pl.BlockSpec((1, Hg), lambda i: (0, 0)),      # b_fc
                pl.BlockSpec((Hg, Eg), lambda i: (0, 0)),     # w_proj (block-diag)
                pl.BlockSpec((1, Eg), lambda i: (0, 0)),      # b_proj
            ],
            out_specs=pl.BlockSpec((bm_g, Eg), lambda i: (i, 0)),
        ),
        compiler_params=pltpu.CompilerParams(
            dimension_semantics=("parallel",)),               # v7x: 2 TCs split rows
    )(x_dense, w_fc_big, b_fc_big, w_proj_big, b_proj_big)

    y = y_dense.reshape(Mp, E)
    if Mp != M:
        y = y[:M]
    return y.reshape(*lead, E)


# ----------------------- parameter init (Conv1D layout: w=(in,out)) -----------------------
def init_params(key):
    # Conv1D inits b to zeros in PyTorch; random small biases used here for a
    # stronger numerical check of the fused kernel.
    std = 0.02
    k_wfc, k_wproj, k_bfc, k_bproj = jax.random.split(key, 4)
    return dict(
        # c_fc = Conv1D(nf=n_state, rf=1, nx=n_embd): w (nx, nf), b (nf,)
        w_fc=std * jax.random.normal(k_wfc, (N_EMBD, N_STATE), jnp.float32),
        b_fc=std * jax.random.normal(k_bfc, (N_STATE,), jnp.float32),
        # c_proj = Conv1D(nf=n_embd, rf=1, nx=n_state): w (n_state, n_embd)
        w_proj=std * jax.random.normal(k_wproj, (N_STATE, N_EMBD), jnp.float32),
        b_proj=std * jax.random.normal(k_bproj, (N_EMBD,), jnp.float32),
    )


# ----------------------- main -----------------------
if __name__ == "__main__":
    B, T = 2, 8
    key = jax.random.PRNGKey(0)
    k_params, k_x = jax.random.split(key)
    params = init_params(k_params)
    x = jax.random.normal(k_x, (B, T, N_EMBD), jnp.float32)

    fwd = jax.jit(functools.partial(mlp_forward, afn=AFN))
    y = fwd(params, x)
    jax.block_until_ready(y)

    # plain-JAX reference of the same forward pass (uses the original, non
    # block-diagonal weights -> independently checks the lane-dense packing)
    ref = (_gelu(x @ params["w_fc"] + params["b_fc"]) @ params["w_proj"]
           + params["b_proj"])

    assert y.shape == (B, T, N_EMBD)
    assert bool(jnp.isfinite(y).all())
    assert bool(jnp.allclose(y, ref, atol=1e-5, rtol=1e-5))
    print("KERNEL_OK")
</pallas_src>

<mosaic_0001>
module attributes {stable_mosaic.version = 11 : i64} {
  func.func @mlp_kernel(%arg0: i32, %arg1: memref<8x128xf32, #tpu.memory_space<vmem>>, %arg2: memref<128x512xf32, #tpu.memory_space<vmem>>, %arg3: memref<1x512xf32, #tpu.memory_space<vmem>>, %arg4: memref<512x128xf32, #tpu.memory_space<vmem>>, %arg5: memref<1x128xf32, #tpu.memory_space<vmem>>, %arg6: memref<8x128xf32, #tpu.memory_space<vmem>>) attributes {dimension_semantics = [#tpu.dimension_semantics<parallel>], iteration_bounds = array<i64: 1>, scalar_prefetch = 0 : i64, scratch_operands = 0 : i64, tpu.core_type = #tpu.core_type<tc>, window_params = [{transform_indices = @transform_0, window_bounds = array<i64: 8, 128>}, {pipeline_mode = #tpu.pipeline_mode<synchronous>, transform_indices = @transform_1, window_bounds = array<i64: 128, 512>}, {pipeline_mode = #tpu.pipeline_mode<synchronous>, transform_indices = @transform_2, window_bounds = array<i64: 1, 512>}, {pipeline_mode = #tpu.pipeline_mode<synchronous>, transform_indices = @transform_3, window_bounds = array<i64: 512, 128>}, {pipeline_mode = #tpu.pipeline_mode<synchronous>, transform_indices = @transform_4, window_bounds = array<i64: 1, 128>}, {transform_indices = @transform_5, window_bounds = array<i64: 8, 128>}]} {
    %c0 = arith.constant 0 : index
    %c0_0 = arith.constant 0 : index
    %0 = vector.load %arg1[%c0, %c0_0] : memref<8x128xf32, #tpu.memory_space<vmem>>, vector<8x128xf32>
    %c0_1 = arith.constant 0 : index
    %c0_2 = arith.constant 0 : index
    %1 = vector.load %arg2[%c0_1, %c0_2] : memref<128x512xf32, #tpu.memory_space<vmem>>, vector<128x512xf32>
    %cst = arith.constant dense<0.000000e+00> : vector<8x512xf32>
    %2 = tpu.matmul %0, %1, %cst {dimension_numbers = #tpu.dot_dimension_numbers<[1], [0], [0], [1], [0, 0, 1, 1], [], []>} : vector<8x128xf32>, vector<128x512xf32>, vector<8x512xf32> -> vector<8x512xf32>
    %c0_3 = arith.constant 0 : index
    %c0_4 = arith.constant 0 : index
    %3 = vector.load %arg3[%c0_3, %c0_4] : memref<1x512xf32, #tpu.memory_space<vmem>>, vector<1x512xf32>
    %4 = vector.broadcast %3 : vector<1x512xf32> to vector<8x512xf32>
    %5 = arith.addf %2, %4 : vector<8x512xf32>
    %cst_5 = arith.constant 5.000000e-01 : f32
    %6 = vector.broadcast %cst_5 : f32 to vector<8x512xf32>
    %7 = arith.mulf %6, %5 : vector<8x512xf32>
    %8 = arith.mulf %5, %5 : vector<8x512xf32>
    %9 = arith.mulf %8, %5 : vector<8x512xf32>
    %cst_6 = arith.constant 4.471500e-02 : f32
    %10 = vector.broadcast %cst_6 : f32 to vector<8x512xf32>
    %11 = arith.mulf %10, %9 : vector<8x512xf32>
    %12 = arith.addf %5, %11 : vector<8x512xf32>
    %cst_7 = arith.constant 0.797884583 : f32
    %13 = vector.broadcast %cst_7 : f32 to vector<8x512xf32>
    %14 = arith.mulf %13, %12 : vector<8x512xf32>
    %15 = math.tanh %14 : vector<8x512xf32>
    %cst_8 = arith.constant 1.000000e+00 : f32
    %16 = vector.broadcast %cst_8 : f32 to vector<8x512xf32>
    %17 = arith.addf %16, %15 : vector<8x512xf32>
    %18 = arith.mulf %7, %17 : vector<8x512xf32>
    %c0_9 = arith.constant 0 : index
    %c0_10 = arith.constant 0 : index
    %19 = vector.load %arg4[%c0_9, %c0_10] : memref<512x128xf32, #tpu.memory_space<vmem>>, vector<512x128xf32>
    %cst_11 = arith.constant dense<0.000000e+00> : vector<8x128xf32>
    %20 = tpu.matmul %18, %19, %cst_11 {dimension_numbers = #tpu.dot_dimension_numbers<[1], [0], [0], [1], [0, 0, 1, 1], [], []>} : vector<8x512xf32>, vector<512x128xf32>, vector<8x128xf32> -> vector<8x128xf32>
    %c0_12 = arith.constant 0 : index
    %c0_13 = arith.constant 0 : index
    %21 = vector.load %arg5[%c0_12, %c0_13] : memref<1x128xf32, #tpu.memory_space<vmem>>, vector<1x128xf32>
    %22 = vector.broadcast %21 : vector<1x128xf32> to vector<8x128xf32>
    %23 = arith.addf %20, %22 : vector<8x128xf32>
    %c0_14 = arith.constant 0 : index
    %c0_15 = arith.constant 0 : index
    %24 = vector.load %arg6[%c0_14, %c0_15] : memref<8x128xf32, #tpu.memory_space<vmem>>, vector<8x128xf32>
    tpu.vector_store %arg6[%c0_14, %c0_15], %23 {strides = array<i32>} : memref<8x128xf32, #tpu.memory_space<vmem>>, vector<8x128xf32>,
    return
  }
  func.func @transform_0(%arg0: i32) -> (i32, i32) {
    %c0_i32 = arith.constant 0 : i32
    %c0_i32_0 = arith.constant 0 : i32
    return %arg0, %c0_i32 : i32, i32
  }
  func.func @transform_1(%arg0: i32) -> (i32, i32) {
    %c0_i32 = arith.constant 0 : i32
    %c0_i32_0 = arith.constant 0 : i32
    %c0_i32_1 = arith.constant 0 : i32
    return %c0_i32, %c0_i32_0 : i32, i32
  }
  func.func @transform_2(%arg0: i32) -> (i32, i32) {
    %c0_i32 = arith.constant 0 : i32
    %c0_i32_0 = arith.constant 0 : i32
    %c0_i32_1 = arith.constant 0 : i32
    return %c0_i32, %c0_i32_0 : i32, i32
  }
  func.func @transform_3(%arg0: i32) -> (i32, i32) {
    %c0_i32 = arith.constant 0 : i32
    %c0_i32_0 = arith.constant 0 : i32
    %c0_i32_1 = arith.constant 0 : i32
    return %c0_i32, %c0_i32_0 : i32, i32
  }
  func.func @transform_4(%arg0: i32) -> (i32, i32) {
    %c0_i32 = arith.constant 0 : i32
    %c0_i32_0 = arith.constant 0 : i32
    %c0_i32_1 = arith.constant 0 : i32
    return %c0_i32, %c0_i32_0 : i32, i32
  }
  func.func @transform_5(%arg0: i32) -> (i32, i32) {
    %c0_i32 = arith.constant 0 : i32
    %c0_i32_0 = arith.constant 0 : i32
    return %arg0, %c0_i32 : i32, i32
  }
}

</mosaic_0001>

<bundles_post_ra>
// kernel: tile.18
= control target key start
LH: loop header
LB: loop body
LE: loop exit
PB: predicated region body
PF: predicated region fallthrough
CT: control target
= control target key end

     0   :  { %s22_s0 = inlined_call_operand.vmem [shape: f32[32], index: 0, kind: input, shape index: {}]   ;;  %s23_s1 = inlined_call_operand.vmem [shape: f32[4,32], index: 1, kind: output, shape index: {}]  }
   0x1   :  { %v4_v0 = vld [vmem:[%s22_s0] ss:$0 sm:$0xff] }
   0x2   :  { %5 = vst [vmem:[%s23_s1] sm:$0xf] %v4_v0 }

// kernel: tile.19
= control target key start
LH: loop header
LB: loop body
LE: loop exit
PB: predicated region body
PF: predicated region fallthrough
CT: control target
= control target key end

     0   :  { %s37_s8 = smov 32   ;;  %s38_s9 = smov 64   ;;  %vm7_vm0 = vcmask 261120   ;;  %vm13_vm1 = vcmask 1048320   ;;  %vm19_vm2 = vcmask 785920   ;;  %vm25_vm3 = vcmask 523520   ;;  %s55_s0 = inlined_call_operand.vmem [shape: f32[4,32], index: 0, kind: input, shape index: {}]   ;;  %s56_s1 = inlined_call_operand.vmem [shape: f32[1,128], index: 1, kind: output, shape index: {}]  }
   0x1   :  { %v4_v0 = vld [vmem:[%s55_s0] sm:$0xf]  ;;  %s36_s0 = smov 96  }
   0x2   :  { %5 = vst [vmem:[#allocation1] sm:$0xf] %v4_v0 }
   0x9   :  { %v10_v1 = vld [vmem:[#allocation1 + $0x3] sm:$0x1]   ;;  %v22_v2 = vld [vmem:[#allocation1 + $0x1] sm:$0x1]   ;;  %v16_v3 = vld [vmem:[#allocation1 + $0x2] sm:$0x1]  }
   0xa   :  { %11 = vrot.lane.b32.xlu0 %v10_v1, %s36_s0  ;;  %23 = vrot.lane.b32.xlu1 %v22_v2, %s37_s8  ;;  %v6_v4 = vld [vmem:[#allocation1] sm:$0x1]  }
   0xb   :  { %8 = vst.msk [vmem:[#allocation0] sm:$0x1] %vm7_vm0, %v6_v4  }
  0x12   :  { %17 = vrot.lane.b32.xlu0 %v16_v3, %s38_s9 }
  0x7c   :  { %v12_v5 = vpop.permute.xlu0 %11   ;;  %v24_v6 = vpop.permute.xlu1 %23  }
  0x7d   :  { %14 = vst.msk [vmem:[#allocation0] sm:$0x1] %vm13_vm1, %v12_v5  }
  0x84   :  { %v18_v7 = vpop.permute.xlu0 %17  }
  0x85   :  { %20 = vst.msk [vmem:[#allocation0] sm:$0x1] %vm19_vm2, %v18_v7  }
  0x86   :  { %26 = vst.msk [vmem:[#allocation0] sm:$0x1] %vm25_vm3, %v24_v6  }
  0x8d   :  { %v29_v8 = vld [vmem:[#allocation0] sm:$0x1] }
  0x8e   :  { %32 = vst [vmem:[%s56_s1] sm:$0x1] %v29_v8 }

// kernel: tile.13
= control target key start
LH: loop header
LB: loop body
LE: loop exit
PB: predicated region body
PF: predicated region fallthrough
CT: control target
= control target key end

     0   :  { %s22_s0 = inlined_call_operand.vmem [shape: f32[128], index: 0, kind: input, shape index: {}]   ;;  %s23_s1 = inlined_call_operand.vmem [shape: f32[4,128], index: 1, kind: output, shape index: {}]  }
   0x1   :  { %v4_v0 = vld [vmem:[%s22_s0] ss:$0 sm:$0xff] }
   0x2   :  { %5 = vst [vmem:[%s23_s1] sm:$0xf] %v4_v0 }

// kernel: mlp_forward.1
= control target key start
LH: loop header
LB: loop body
LE: loop exit
PB: predicated region body
PF: predicated region fallthrough
CT: control target
= control target key end

     0   :  { %s799_s1 = inlined_call_operand.vmem [shape: f32[128,512], index: 1, kind: input, shape index: {}]   ;;  %s800_s0 = inlined_call_operand.vmem [shape: f32[8,128], index: 0, kind: input, shape index: {}]   ;;  %s801_s3 = inlined_call_operand.vmem [shape: f32[512,128], index: 3, kind: input, shape index: {}]   ;;  %s802_s4 = inlined_call_operand.vmem [shape: f32[1,128], index: 4, kind: input, shape index: {}]   ;;  %s803_s2 = inlined_call_operand.vmem [shape: f32[1,512], index: 2, kind: input, shape index: {}]   ;;  %s804_s5 = inlined_call_operand.vmem [shape: f32[8,128], index: 5, kind: output, shape index: {}]  }
   0x1   :  { %v81_v0 = vld [vmem:[%s799_s1 + $0x1e0] sm:$0xff]  ;;  %v82_v1 = vld [vmem:[%s799_s1 + $0x1e8] sm:$0xff]  ;;  %v83_v2 = vld [vmem:[%s799_s1 + $0x1f0] sm:$0xff] }
   0x2   :  { %95 = vmatpush.msra.mxu0 %v81_v0  ;;  %115 = vmatpush.msra.mxu1 %v82_v1  ;;  %v84_v3 = vld [vmem:[%s799_s1 + $0x1f8] sm:$0xff]  ;;  %v77_v4 = vld [vmem:[%s799_s1 + $0x1c0] sm:$0xff]  ;;  %v78_v5 = vld [vmem:[%s799_s1 + $0x1c8] sm:$0xff] }
   0x3   :  { %135 = vmatpush.msra.mxu2 %v83_v2  ;;  %155 = vmatpush.msra.mxu3 %v84_v3  ;;  %v79_v6 = vld [vmem:[%s799_s1 + $0x1d0] sm:$0xff]  ;;  %v80_v7 = vld [vmem:[%s799_s1 + $0x1d8] sm:$0xff]  ;;  %v73_v8 = vld [vmem:[%s799_s1 + $0x1a0] sm:$0xff] }
   0x4   :  { %96 = vmatpush.msra.mxu0 %v77_v4  ;;  %116 = vmatpush.msra.mxu1 %v78_v5  ;;  %v74_v9 = vld [vmem:[%s799_s1 + $0x1a8] sm:$0xff]  ;;  %v75_v10 = vld [vmem:[%s799_s1 + $0x1b0] sm:$0xff]  ;;  %v76_v11 = vld [vmem:[%s799_s1 + $0x1b8] sm:$0xff] }
   0x5   :  { %136 = vmatpush.msra.mxu2 %v79_v6  ;;  %156 = vmatpush.msra.mxu3 %v80_v7  ;;  %v69_v12 = vld [vmem:[%s799_s1 + $0x180] sm:$0xff]  ;;  %v70_v13 = vld [vmem:[%s799_s1 + $0x188] sm:$0xff]  ;;  %v71_v14 = vld [vmem:[%s799_s1 + $0x190] sm:$0xff] }
   0x6   :  { %97 = vmatpush.msra.mxu0 %v73_v8  ;;  %117 = vmatpush.msra.mxu1 %v74_v9  ;;  %v72_v15 = vld [vmem:[%s799_s1 + $0x198] sm:$0xff]  ;;  %v65_v16 = vld [vmem:[%s799_s1 + $0x160] sm:$0xff]  ;;  %v66_v17 = vld [vmem:[%s799_s1 + $0x168] sm:$0xff] }
   0x7   :  { %137 = vmatpush.msra.mxu2 %v75_v10  ;;  %157 = vmatpush.msra.mxu3 %v76_v11  ;;  %v67_v18 = vld [vmem:[%s799_s1 + $0x170] sm:$0xff]  ;;  %v68_v19 = vld [vmem:[%s799_s1 + $0x178] sm:$0xff]  ;;  %v61_v20 = vld [vmem:[%s799_s1 + $0x140] sm:$0xff] }
   0x8   :  { %98 = vmatpush.msra.mxu0 %v69_v12  ;;  %118 = vmatpush.msra.mxu1 %v70_v13  ;;  %v62_v21 = vld [vmem:[%s799_s1 + $0x148] sm:$0xff]  ;;  %v63_v22 = vld [vmem:[%s799_s1 + $0x150] sm:$0xff]  ;;  %v64_v23 = vld [vmem:[%s799_s1 + $0x158] sm:$0xff] }
   0x9   :  { %138 = vmatpush.msra.mxu2 %v71_v14  ;;  %158 = vmatpush.msra.mxu3 %v72_v15  ;;  %v57_v24 = vld [vmem:[%s799_s1 + $0x120] sm:$0xff]  ;;  %v58_v25 = vld [vmem:[%s799_s1 + $0x128] sm:$0xff]  ;;  %v59_v26 = vld [vmem:[%s799_s1 + $0x130] sm:$0xff] }
   0xa   :  { %99 = vmatpush.msra.mxu0 %v65_v16  ;;  %119 = vmatpush.msra.mxu1 %v66_v17  ;;  %v60_v27 = vld [vmem:[%s799_s1 + $0x138] sm:$0xff]  ;;  %v53_v28 = vld [vmem:[%s799_s1 + $0x100] sm:$0xff]  ;;  %v54_v29 = vld [vmem:[%s799_s1 + $0x108] sm:$0xff] }
   0xb   :  { %139 = vmatpush.msra.mxu2 %v67_v18  ;;  %159 = vmatpush.msra.mxu3 %v68_v19  ;;  %v55_v30 = vld [vmem:[%s799_s1 + $0x110] sm:$0xff]  ;;  %v56_v31 = vld [vmem:[%s799_s1 + $0x118] sm:$0xff]  ;;  %v49_v32 = vld [vmem:[%s799_s1 + $0xe0] sm:$0xff] }
   0xc   :  { %100 = vmatpush.msra.mxu0 %v61_v20  ;;  %120 = vmatpush.msra.mxu1 %v62_v21  ;;  %v50_v33 = vld [vmem:[%s799_s1 + $0xe8] sm:$0xff]  ;;  %v51_v34 = vld [vmem:[%s799_s1 + $0xf0] sm:$0xff]  ;;  %v52_v35 = vld [vmem:[%s799_s1 + $0xf8] sm:$0xff] }
   0xd   :  { %140 = vmatpush.msra.mxu2 %v63_v22  ;;  %160 = vmatpush.msra.mxu3 %v64_v23  ;;  %v45_v36 = vld [vmem:[%s799_s1 + $0xc0] sm:$0xff]  ;;  %v46_v37 = vld [vmem:[%s799_s1 + $0xc8] sm:$0xff]  ;;  %v47_v38 = vld [vmem:[%s799_s1 + $0xd0] sm:$0xff] }
   0xe   :  { %101 = vmatpush.msra.mxu0 %v57_v24  ;;  %121 = vmatpush.msra.mxu1 %v58_v25  ;;  %v48_v39 = vld [vmem:[%s799_s1 + $0xd8] sm:$0xff]  ;;  %v41_v40 = vld [vmem:[%s799_s1 + $0xa0] sm:$0xff]  ;;  %v42_v41 = vld [vmem:[%s799_s1 + $0xa8] sm:$0xff] }
   0xf   :  { %141 = vmatpush.msra.mxu2 %v59_v26  ;;  %161 = vmatpush.msra.mxu3 %v60_v27  ;;  %v43_v42 = vld [vmem:[%s799_s1 + $0xb0] sm:$0xff]  ;;  %v44_v43 = vld [vmem:[%s799_s1 + $0xb8] sm:$0xff]  ;;  %v37_v44 = vld [vmem:[%s799_s1 + $0x80] sm:$0xff] }
  0x10   :  { %102 = vmatpush.msra.mxu0 %v53_v28  ;;  %122 = vmatpush.msra.mxu1 %v54_v29  ;;  %v38_v45 = vld [vmem:[%s799_s1 + $0x88] sm:$0xff]  ;;  %v39_v46 = vld [vmem:[%s799_s1 + $0x90] sm:$0xff]  ;;  %v40_v47 = vld [vmem:[%s799_s1 + $0x98] sm:$0xff] }
  0x11   :  { %142 = vmatpush.msra.mxu2 %v55_v30  ;;  %162 = vmatpush.msra.mxu3 %v56_v31  ;;  %v33_v48 = vld [vmem:[%s799_s1 + $0x60] sm:$0xff]  ;;  %v34_v49 = vld [vmem:[%s799_s1 + $0x68] sm:$0xff]  ;;  %v35_v50 = vld [vmem:[%s799_s1 + $0x70] sm:$0xff] }
  0x12   :  { %103 = vmatpush.msra.mxu0 %v49_v32  ;;  %123 = vmatpush.msra.mxu1 %v50_v33  ;;  %v36_v51 = vld [vmem:[%s799_s1 + $0x78] sm:$0xff]  ;;  %v29_v52 = vld [vmem:[%s799_s1 + $0x40] sm:$0xff]  ;;  %v30_v53 = vld [vmem:[%s799_s1 + $0x48] sm:$0xff] }
  0x13   :  { %143 = vmatpush.msra.mxu2 %v51_v34  ;;  %163 = vmatpush.msra.mxu3 %v52_v35  ;;  %v31_v54 = vld [vmem:[%s799_s1 + $0x50] sm:$0xff]  ;;  %v32_v55 = vld [vmem:[%s799_s1 + $0x58] sm:$0xff]  ;;  %v25_v56 = vld [vmem:[%s799_s1 + $0x20] sm:$0xff] }
  0x14   :  { %104 = vmatpush.msra.mxu0 %v45_v36  ;;  %124 = vmatpush.msra.mxu1 %v46_v37  ;;  %v26_v57 = vld [vmem:[%s799_s1 + $0x28] sm:$0xff]  ;;  %v27_v58 = vld [vmem:[%s799_s1 + $0x30] sm:$0xff]  ;;  %v28_v59 = vld [vmem:[%s799_s1 + $0x38] sm:$0xff] }
  0x15   :  { %144 = vmatpush.msra.mxu2 %v47_v38  ;;  %164 = vmatpush.msra.mxu3 %v48_v39  ;;  %v21_v60 = vld [vmem:[%s799_s1] sm:$0xff]  ;;  %v22_v61 = vld [vmem:[%s799_s1 + $0x8] sm:$0xff]  ;;  %v23_v62 = vld [vmem:[%s799_s1 + $0x10] sm:$0xff] }
  0x16   :  { %105 = vmatpush.msra.mxu0 %v41_v40  ;;  %125 = vmatpush.msra.mxu1 %v42_v41  ;;  %v24_v63 = vld [vmem:[%s799_s1 + $0x18] sm:$0xff]  ;;  %v20_v0 = vld [vmem:[%s800_s0] sm:$0xff]  ;;  %v225_v5 = vld [vmem:[%s801_s3 + $0x70] sm:$0xff] }
  0x17   :  { %145 = vmatpush.msra.mxu2 %v43_v42  ;;  %165 = vmatpush.msra.mxu3 %v44_v43  ;;  %v226_v1 = vld [vmem:[%s801_s3 + $0x78] sm:$0xff]  ;;  %v241_v6 = vld [vmem:[%s801_s3 + $0xf0] sm:$0xff]  ;;  %v224_v7 = vld [vmem:[%s801_s3 + $0x68] sm:$0xff] }
  0x18   :  { %106 = vmatpush.msra.mxu0 %v37_v44  ;;  %126 = vmatpush.msra.mxu1 %v38_v45  ;;  %v242_v2 = vld [vmem:[%s801_s3 + $0xf8] sm:$0xff]  ;;  %v240_v8 = vld [vmem:[%s801_s3 + $0xe8] sm:$0xff]  ;;  %v223_v9 = vld [vmem:[%s801_s3 + $0x60] sm:$0xff] }
  0x19   :  { %146 = vmatpush.msra.mxu2 %v39_v46  ;;  %166 = vmatpush.msra.mxu3 %v40_v47  ;;  %v258_v3 = vld [vmem:[%s801_s3 + $0x178] sm:$0xff]  ;;  %v239_v10 = vld [vmem:[%s801_s3 + $0xe0] sm:$0xff]  ;;  %v257_v13 = vld [vmem:[%s801_s3 + $0x170] sm:$0xff] }
  0x1a   :  { %107 = vmatpush.msra.mxu0 %v33_v48  ;;  %127 = vmatpush.msra.mxu1 %v34_v49  ;;  %v274_v4 = vld [vmem:[%s801_s3 + $0x1f8] sm:$0xff]  ;;  %v273_v14 = vld [vmem:[%s801_s3 + $0x1f0] sm:$0xff]  ;;  %v256_v17 = vld [vmem:[%s801_s3 + $0x168] sm:$0xff] }
  0x1b   :  { %147 = vmatpush.msra.mxu2 %v35_v50  ;;  %167 = vmatpush.msra.mxu3 %v36_v51  ;;  %v222_v11 = vld [vmem:[%s801_s3 + $0x58] sm:$0xff]  ;;  %v221_v15 = vld [vmem:[%s801_s3 + $0x50] sm:$0xff]  ;;  %v272_v18 = vld [vmem:[%s801_s3 + $0x1e8] sm:$0xff] }
  0x1c   :  { %108 = vmatpush.msra.mxu0 %v29_v52  ;;  %128 = vmatpush.msra.mxu1 %v30_v53  ;;  %v238_v12 = vld [vmem:[%s801_s3 + $0xd8] sm:$0xff]  ;;  %v237_v16 = vld [vmem:[%s801_s3 + $0xd0] sm:$0xff]  ;;  %v220_v19 = vld [vmem:[%s801_s3 + $0x48] sm:$0xff] }
  0x1d   :  { %148 = vmatpush.msra.mxu2 %v31_v54  ;;  %168 = vmatpush.msra.mxu3 %v32_v55  ;;  %v236_v20 = vld [vmem:[%s801_s3 + $0xc8] sm:$0xff]  ;;  %v255_v21 = vld [vmem:[%s801_s3 + $0x160] sm:$0xff]  ;;  %v254_v25 = vld [vmem:[%s801_s3 + $0x158] sm:$0xff] }
  0x1e   :  { %109 = vmatpush.msra.mxu0 %v25_v56  ;;  %129 = vmatpush.msra.mxu1 %v26_v57  ;;  %v271_v22 = vld [vmem:[%s801_s3 + $0x1e0] sm:$0xff]  ;;  %v270_v26 = vld [vmem:[%s801_s3 + $0x1d8] sm:$0xff]  ;;  %v253_v29 = vld [vmem:[%s801_s3 + $0x150] sm:$0xff] }
  0x1f   :  { %149 = vmatpush.msra.mxu2 %v27_v58  ;;  %169 = vmatpush.msra.mxu3 %v28_v59  ;;  %v219_v23 = vld [vmem:[%s801_s3 + $0x40] sm:$0xff]  ;;  %v218_v27 = vld [vmem:[%s801_s3 + $0x38] sm:$0xff]  ;;  %v269_v30 = vld [vmem:[%s801_s3 + $0x1d0] sm:$0xff] }
  0x20   :  { %110 = vmatpush.msra.mxu0 %v21_v60  ;;  %130 = vmatpush.msra.mxu1 %v22_v61  ;;  %v235_v24 = vld [vmem:[%s801_s3 + $0xc0] sm:$0xff]  ;;  %v234_v28 = vld [vmem:[%s801_s3 + $0xb8] sm:$0xff]  ;;  %v217_v31 = vld [vmem:[%s801_s3 + $0x30] sm:$0xff] }
  0x21   :  { %150 = vmatpush.msra.mxu2 %v23_v62  ;;  %170 = vmatpush.msra.mxu3 %v24_v63  ;;  %v233_v32 = vld [vmem:[%s801_s3 + $0xb0] sm:$0xff]  ;;  %v252_v33 = vld [vmem:[%s801_s3 + $0x148] sm:$0xff]  ;;  %v251_v37 = vld [vmem:[%s801_s3 + $0x140] sm:$0xff] }
  0x22   :  { %111 = vmatmul.f32.vlgmr.msra.gmra.mxu0 %v20_v0  ;;  %131 = vmatmul.f32.vlgmr.msra.gmra.mxu1 %v20_v0  ;;  %v268_v34 = vld [vmem:[%s801_s3 + $0x1c8] sm:$0xff]  ;;  %v267_v38 = vld [vmem:[%s801_s3 + $0x1c0] sm:$0xff]  ;;  %v250_v41 = vld [vmem:[%s801_s3 + $0x138] sm:$0xff] }
  0x23   :  { %151 = vmatmul.f32.vlgmr.msra.gmra.mxu2 %v20_v0  ;;  %171 = vmatmul.f32.vlgmr.msra.gmra.mxu3 %v20_v0  ;;  %v216_v35 = vld [vmem:[%s801_s3 + $0x28] sm:$0xff]  ;;  %v215_v39 = vld [vmem:[%s801_s3 + $0x20] sm:$0xff]  ;;  %v266_v42 = vld [vmem:[%s801_s3 + $0x1b8] sm:$0xff] }
  0x24   :  { %279 = vmatpush.msrb.mxu0 %v226_v1  ;;  %299 = vmatpush.msrb.mxu1 %v242_v2  ;;  %v232_v36 = vld [vmem:[%s801_s3 + $0xa8] sm:$0xff]  ;;  %v231_v40 = vld [vmem:[%s801_s3 + $0xa0] sm:$0xff]  ;;  %v214_v43 = vld [vmem:[%s801_s3 + $0x18] sm:$0xff] }
  0x25   :  { %319 = vmatpush.msrb.mxu2 %v258_v3  ;;  %339 = vmatpush.msrb.mxu3 %v274_v4  ;;  %v230_v44 = vld [vmem:[%s801_s3 + $0x98] sm:$0xff]  ;;  %v249_v45 = vld [vmem:[%s801_s3 + $0x130] sm:$0xff]  ;;  %v248_v49 = vld [vmem:[%s801_s3 + $0x128] sm:$0xff] }
  0x26   :  { %280 = vmatpush.msrb.mxu0 %v225_v5  ;;  %300 = vmatpush.msrb.mxu1 %v241_v6  ;;  %v265_v46 = vld [vmem:[%s801_s3 + $0x1b0] sm:$0xff]  ;;  %v264_v50 = vld [vmem:[%s801_s3 + $0x1a8] sm:$0xff]  ;;  %v247_v53 = vld [vmem:[%s801_s3 + $0x120] sm:$0xff] }
  0x27   :  { %320 = vmatpush.msrb.mxu2 %v257_v13  ;;  %340 = vmatpush.msrb.mxu3 %v273_v14  ;;  %v213_v47 = vld [vmem:[%s801_s3 + $0x10] sm:$0xff]  ;;  %v212_v51 = vld [vmem:[%s801_s3 + $0x8] sm:$0xff]  ;;  %v263_v54 = vld [vmem:[%s801_s3 + $0x1a0] sm:$0xff] }
  0x28   :  { %281 = vmatpush.msrb.mxu0 %v224_v7  ;;  %301 = vmatpush.msrb.mxu1 %v240_v8  ;;  %v229_v48 = vld [vmem:[%s801_s3 + $0x90] sm:$0xff]  ;;  %v228_v52 = vld [vmem:[%s801_s3 + $0x88] sm:$0xff]  ;;  %v211_v55 = vld [vmem:[%s801_s3] sm:$0xff] }
  0x29   :  { %321 = vmatpush.msrb.mxu2 %v256_v17  ;;  %341 = vmatpush.msrb.mxu3 %v272_v18  ;;  %v227_v56 = vld [vmem:[%s801_s3 + $0x80] sm:$0xff]  ;;  %v246_v57 = vld [vmem:[%s801_s3 + $0x118] sm:$0xff]  ;;  %v245_v59 = vld [vmem:[%s801_s3 + $0x110] sm:$0xff] }
  0x2a   :  { %282 = vmatpush.msrb.mxu0 %v223_v9  ;;  %302 = vmatpush.msrb.mxu1 %v239_v10  ;;  %v262_v58 = vld [vmem:[%s801_s3 + $0x198] sm:$0xff]  ;;  %v261_v60 = vld [vmem:[%s801_s3 + $0x190] sm:$0xff]  ;;  %v85_v61 = vld [vmem:[%s803_s2] sm:$0xf] }
  0x2b   :  { %322 = vmatpush.msrb.mxu2 %v255_v21  ;;  %342 = vmatpush.msrb.mxu3 %v271_v22  ;;  %v244_v62 = vld [vmem:[%s801_s3 + $0x108] sm:$0xff]  ;;  %v243_v0 = vld [vmem:[%s801_s3 + $0x100] sm:$0xff]  ;;  %v87_v2 = vperm.slane %v85_v61, 0  ;;  %v88_v3 = vperm.slane %v85_v61, 1  ;;  %v89_v10 = vperm.slane %v85_v61, 2 }
  0x2c   :  { %283 = vmatpush.msrb.mxu0 %v222_v11  ;;  %303 = vmatpush.msrb.mxu1 %v238_v12  ;;  %v260_v63 = vld [vmem:[%s801_s3 + $0x188] sm:$0xff]  ;;  %v259_v1 = vld [vmem:[%s801_s3 + $0x180] sm:$0xff]  ;;  %v90_v11 = vperm.slane %v85_v61, 3 }
  0x2d   :  { %323 = vmatpush.msrb.mxu2 %v254_v25  ;;  %343 = vmatpush.msrb.mxu3 %v270_v26 }
  0x2e   :  { %284 = vmatpush.msrb.mxu0 %v221_v15  ;;  %304 = vmatpush.msrb.mxu1 %v237_v16 }
  0x2f   :  { %324 = vmatpush.msrb.mxu2 %v253_v29  ;;  %344 = vmatpush.msrb.mxu3 %v269_v30 }
  0x30   :  { %285 = vmatpush.msrb.mxu0 %v220_v19  ;;  %305 = vmatpush.msrb.mxu1 %v236_v20 }
  0x31   :  { %325 = vmatpush.msrb.mxu2 %v252_v33  ;;  %345 = vmatpush.msrb.mxu3 %v268_v34 }
  0x32   :  { %286 = vmatpush.msrb.mxu0 %v219_v23  ;;  %306 = vmatpush.msrb.mxu1 %v235_v24 }
  0x33   :  { %326 = vmatpush.msrb.mxu2 %v251_v37  ;;  %346 = vmatpush.msrb.mxu3 %v267_v38 }
  0x34   :  { %287 = vmatpush.msrb.mxu0 %v218_v27  ;;  %307 = vmatpush.msrb.mxu1 %v234_v28 }
  0x35   :  { %327 = vmatpush.msrb.mxu2 %v250_v41  ;;  %347 = vmatpush.msrb.mxu3 %v266_v42 }
  0x36   :  { %288 = vmatpush.msrb.mxu0 %v217_v31  ;;  %308 = vmatpush.msrb.mxu1 %v233_v32 }
  0x37   :  { %328 = vmatpush.msrb.mxu2 %v249_v45  ;;  %348 = vmatpush.msrb.mxu3 %v265_v46 }
  0x38   :  { %289 = vmatpush.msrb.mxu0 %v216_v35  ;;  %309 = vmatpush.msrb.mxu1 %v232_v36 }
  0x39   :  { %329 = vmatpush.msrb.mxu2 %v248_v49  ;;  %349 = vmatpush.msrb.mxu3 %v264_v50  ;;  %v364_v50 = vld [vmem:[%s802_s4] ss:$0 sm:$0xff] }
  0x3a   :  { %290 = vmatpush.msrb.mxu0 %v215_v39  ;;  %310 = vmatpush.msrb.mxu1 %v231_v40 }
  0x3b   :  { %330 = vmatpush.msrb.mxu2 %v247_v53  ;;  %350 = vmatpush.msrb.mxu3 %v263_v54 }
  0x3c   :  { %291 = vmatpush.msrb.mxu0 %v214_v43  ;;  %311 = vmatpush.msrb.mxu1 %v230_v44 }
  0x3d   :  { %331 = vmatpush.msrb.mxu2 %v246_v57  ;;  %351 = vmatpush.msrb.mxu3 %v262_v58 }
  0x3e   :  { %292 = vmatpush.msrb.mxu0 %v213_v47  ;;  %312 = vmatpush.msrb.mxu1 %v229_v48 }
  0x3f   :  { %332 = vmatpush.msrb.mxu2 %v245_v59  ;;  %352 = vmatpush.msrb.mxu3 %v261_v60 }
  0x40   :  { %293 = vmatpush.msrb.mxu0 %v212_v51  ;;  %313 = vmatpush.msrb.mxu1 %v228_v52 }
  0x41   :  { %333 = vmatpush.msrb.mxu2 %v244_v62  ;;  %353 = vmatpush.msrb.mxu3 %v260_v63 }
  0x42   :  { %294 = vmatpush.msrb.mxu0 %v211_v55  ;;  %314 = vmatpush.msrb.mxu1 %v227_v56 }
  0x43   :  { %334 = vmatpush.msrb.mxu2 %v243_v0  ;;  %354 = vmatpush.msrb.mxu3 %v259_v1 }
  0x9f   :  { %v112_v4 = vpop.f32.mrf.mxu0  ;;  %v132_v5 = vpop.f32.mrf.mxu1 }
  0xa0   :  { %v113_v6 = vadd.f32 %v112_v4, %v87_v2  ;;  %v133_v7 = vadd.f32 %v132_v5, %v88_v3 }
  0xa2   :  { %v179_v8 = vmul.f32 %v113_v6, %v113_v6  ;;  %v180_v9 = vmul.f32 %v133_v7, %v133_v7  ;;  %v175_v36 = vmul.f32 0.5, %v113_v6  ;;  %v176_v38 = vmul.f32 0.5, %v133_v7 }
  0xa4   :  { %v183_v12 = vmul.f32 %v179_v8, %v113_v6  ;;  %v184_v13 = vmul.f32 %v180_v9, %v133_v7 }
  0xa6   :  { %v187_v14 = vmul.f32 0.044715, %v183_v12  ;;  %v188_v15 = vmul.f32 0.044715, %v184_v13  ;;  %v152_v16 = vpop.f32.mrf.mxu2  ;;  %v172_v17 = vpop.f32.mrf.mxu3 }
  0xa7   :  { %v153_v18 = vadd.f32 %v152_v16, %v89_v10  ;;  %v173_v19 = vadd.f32 %v172_v17, %v90_v11 }
  0xa8   :  { %v191_v20 = vadd.f32 %v187_v14, %v113_v6  ;;  %v192_v21 = vadd.f32 %v188_v15, %v133_v7 }
  0xa9   :  { %v181_v22 = vmul.f32 %v153_v18, %v153_v18  ;;  %v182_v23 = vmul.f32 %v173_v19, %v173_v19  ;;  %v177_v44 = vmul.f32 0.5, %v153_v18  ;;  %v178_v46 = vmul.f32 0.5, %v173_v19 }
  0xaa   :  { %v195_v24 = vmul.f32 0.7978846, %v191_v20  ;;  %v196_v25 = vmul.f32 0.7978846, %v192_v21 }
  0xab   :  { %v185_v26 = vmul.f32 %v181_v22, %v153_v18  ;;  %v186_v27 = vmul.f32 %v182_v23, %v173_v19 }
  0xac   :  { %365 = vtanh.f32 %v195_v24 }
  0xad   :  { %v189_v28 = vmul.f32 0.044715, %v185_v26  ;;  %v190_v29 = vmul.f32 0.044715, %v186_v27  ;;  %367 = vtanh.f32 %v196_v25 }
  0xaf   :  { %v193_v30 = vadd.f32 %v189_v28, %v153_v18  ;;  %v194_v31 = vadd.f32 %v190_v29, %v173_v19 }
  0xb1   :  { %v197_v32 = vmul.f32 0.7978846, %v193_v30  ;;  %v198_v33 = vmul.f32 0.7978846, %v194_v31 }
  0xb2   :  { %v366_v34 = vpop.eup %365 }
  0xb3   :  { %v368_v35 = vpop.eup %367  ;;  %v203_v37 = vadd.f32 1.0, %v366_v34  ;;  %369 = vtanh.f32 %v197_v32 }
  0xb4   :  { %v204_v39 = vadd.f32 1.0, %v368_v35  ;;  %371 = vtanh.f32 %v198_v33 }
  0xb5   :  { %v207_v40 = vmul.f32 %v203_v37, %v175_v36 }
  0xb6   :  { %v208_v41 = vmul.f32 %v204_v39, %v176_v38 }
  0xb7   :  { %295 = vmatmul.f32.vlgmr.msrb.gmra.mxu0 %v207_v40 }
  0xb8   :  { %315 = vmatmul.f32.vlgmr.msrb.gmra.mxu1 %v208_v41 }
  0xb9   :  { %v370_v42 = vpop.eup %369 }
  0xba   :  { %v372_v43 = vpop.eup %371  ;;  %v205_v45 = vadd.f32 1.0, %v370_v42 }
  0xbb   :  { %v206_v47 = vadd.f32 1.0, %v372_v43 }
  0xbc   :  { %v209_v48 = vmul.f32 %v205_v45, %v177_v44 }
  0xbd   :  { %v210_v49 = vmul.f32 %v206_v47, %v178_v46 }
  0xbe   :  { %335 = vmatmul.f32.vlgmr.msrb.gmra.mxu2 %v209_v48 }
  0xbf   :  { %355 = vmatmul.f32.vlgmr.msrb.gmra.mxu3 %v210_v49 }
 0x134   :  { %v296_v51 = vpop.f32.mrf.mxu0 }
 0x135   :  { %v297_v52 = vadd.f32 %v364_v50, %v296_v51  ;;  %v316_v53 = vpop.f32.mrf.mxu1 }
 0x137   :  { %v317_v54 = vadd.f32 %v316_v53, %v297_v52 }
 0x141   :  { %v336_v55 = vpop.f32.mrf.mxu2 }
 0x142   :  { %v337_v56 = vadd.f32 %v336_v55, %v317_v54  ;;  %v356_v57 = vpop.f32.mrf.mxu3 }
 0x144   :  { %v357_v58 = vadd.f32 %v356_v57, %v337_v56 }
 0x146   :  { %359 = vst [vmem:[%s804_s5] sm:$0xff] %v357_v58 }

</bundles_post_ra>
